<compile_context>
chip_gen: v7x
topology: tpu7x:2x2x1
jax: 0.10.0
libtpu: 0.0.40
codegen_flags: <defaults>
</compile_context>

<pallas_src>
import functools

import jax
import jax.numpy as jnp
from jax.experimental import pallas as pl
from jax.experimental.pallas import tpu as pltpu

NUM_CLASSES = 4
IGNORE_INDEX = -100
LANE = 128


def _uce_kernel(logits_ref, targets_ref, sum_ref, cnt_ref, loss_acc, cnt_acc,
                *, true_labs, bg_col, ignore_index, acc_rows, tile_r):
    t_idx = pl.program_id(2)

    @pl.when(t_idx == 0)
    def _():
        loss_acc[...] = jnp.zeros_like(loss_acc)
        cnt_acc[...] = jnp.zeros_like(cnt_acc)

    tgt = targets_ref[0].astype(jnp.int32)                       # (tile_r, 128)
    xs = [logits_ref[0, cc].astype(jnp.float32) for cc in range(NUM_CLASSES)]

    # Shared-exponent softmax pieces.
    m_all = jnp.maximum(jnp.maximum(xs[0], xs[1]), jnp.maximum(xs[2], xs[3]))
    es = [jnp.exp(xc - m_all) for xc in xs]
    s_all = (es[0] + es[1]) + (es[2] + es[3])
    s_un = None
    for cc in range(NUM_CLASSES):
        if cc not in true_labs:
            s_un = es[cc] if s_un is None else s_un + es[cc]

    # Single-log gather of the "unbiased" log-prob at the target class:
    #   target == bg column        -> s_un   (logsumexp(unlabeled) - den)
    #   target in true_labs        -> es[c]  (x_c - den)  [overrides the bg col]
    #   target == other unlabeled  -> s_all  (outputs column stays 0)
    # Same assignment order as the PyTorch module (true_labs written last).
    sel = jnp.where(tgt == bg_col, s_un, s_all)
    for cc in true_labs:
        sel = jnp.where(tgt == cc, es[cc], sel)
    log_s_all = jnp.log(s_all)
    picked = jnp.log(jnp.maximum(sel, 1e-37)) - log_s_all        # log-prob <= 0

    valid = tgt != ignore_index
    contrib = jnp.where(valid, picked, 0.0)
    vcount = valid.astype(jnp.float32)
    if tile_r != acc_rows:
        # Vreg-aligned reshape + vreg adds: (tile_r,128) -> (acc_rows,128).
        contrib = contrib.reshape(tile_r // acc_rows, acc_rows, LANE).sum(axis=0)
        vcount = vcount.reshape(tile_r // acc_rows, acc_rows, LANE).sum(axis=0)
    loss_acc[...] += contrib        # accumulate +log-prob; negate in the wrapper
    cnt_acc[...] += vcount

    @pl.when(t_idx == pl.num_programs(2) - 1)
    def _():
        sum_ref[0, 0] = jnp.sum(loss_acc[...], axis=0, keepdims=True)
        cnt_ref[0, 0] = jnp.sum(cnt_acc[...], axis=0, keepdims=True)


def unbiased_cross_entropy(inputs_nchw, targets, true_labs, *,
                           tile_rows=2048, ignore_index=IGNORE_INDEX,
                           core_split=None):
    n, c, h, w = inputs_nchw.shape
    assert c == NUM_CLASSES
    true_labs = tuple(int(k) for k in true_labs)
    un_labels = tuple(k for k in range(NUM_CLASSES) if k not in true_labs)
    bg_col = 0 if 0 in un_labels else 1

    p = h * w
    x = inputs_nchw.reshape(n, c, p)                 # free reshape, stays NCHW
    t = targets.reshape(n, p).astype(jnp.int8)       # -100 fits in int8

    p_pad = pl.cdiv(p, LANE) * LANE
    if p_pad != p:
        # Only taken when H*W is not a multiple of 128.
        x = jnp.pad(x, ((0, 0), (0, 0), (0, p_pad - p)))
        t = jnp.pad(t, ((0, 0), (0, p_pad - p)), constant_values=ignore_index)
    p128 = p_pad // LANE
    x = x.reshape(n, c, p128, LANE)
    t = t.reshape(n, p128, LANE)

    # Pixel-row tile: biggest that fits comfortably (default 2048 rows = ~4 MiB
    # of logits per step, ~9 MiB double-buffered working set).
    tile_r = min(tile_rows, p128)
    if tile_r < p128:
        tile_r = min(max(8, (tile_r // 8) * 8), p128)
    n_tiles = pl.cdiv(p128, tile_r)

    # v7x megacore: when the batch axis alone can't keep both TensorCores busy
    # (n odd), split the pixel-tile axis into 2 parallel halves.
    if core_split is None:
        core_split = 2 if (n % 2 == 1 and n_tiles >= 2) else 1
    core_split = max(1, min(int(core_split), n_tiles))
    tps = pl.cdiv(n_tiles, core_split)

    # Pad the (cheap) int8 targets so every (split, tile) step is fully covered
    # by real ignore_index rows -> no per-step tail mask inside the kernel.
    p128_t = core_split * tps * tile_r
    if p128_t != p128:
        t = jnp.pad(t, ((0, 0), (0, p128_t - p128), (0, 0)),
                    constant_values=ignore_index)

    acc_rows = 8 if tile_r % 8 == 0 else tile_r
    last_blk = n_tiles - 1

    def logits_index(b, s, i):
        # Clamp: steps past the real pixel range re-read the last (partially
        # OOB) block; their targets are all ignore_index so they contribute 0.
        return (b, 0, jnp.minimum(s * tps + i, last_blk), 0)

    def targets_index(b, s, i):
        return (b, s * tps + i, 0)

    kernel = functools.partial(
        _uce_kernel, true_labs=true_labs, bg_col=bg_col,
        ignore_index=ignore_index, acc_rows=acc_rows, tile_r=tile_r)

    sums, cnts = pl.pallas_call(
        kernel,
        out_shape=(jax.ShapeDtypeStruct((n, core_split, 1, LANE), jnp.float32),
                   jax.ShapeDtypeStruct((n, core_split, 1, LANE), jnp.float32)),
        grid_spec=pltpu.PrefetchScalarGridSpec(
            num_scalar_prefetch=0,
            grid=(n, core_split, tps),
            in_specs=[
                pl.BlockSpec((1, c, tile_r, LANE), logits_index),
                pl.BlockSpec((1, tile_r, LANE), targets_index),
            ],
            out_specs=(
                pl.BlockSpec((1, 1, 1, LANE), lambda b, s, i: (b, s, 0, 0)),
                pl.BlockSpec((1, 1, 1, LANE), lambda b, s, i: (b, s, 0, 0)),
            ),
            scratch_shapes=[pltpu.VMEM((acc_rows, LANE), jnp.float32),
                            pltpu.VMEM((acc_rows, LANE), jnp.float32)]),
        compiler_params=pltpu.CompilerParams(
            dimension_semantics=("parallel", "parallel", "arbitrary"),
            vmem_limit_bytes=32 * 1024 * 1024),
    )(x, t)

    # Final cross-lane reduce + mean + negation.  (NaN if every pixel is
    # ignore_index, matching F.nll_loss(reduction='mean') semantics.)
    return -(jnp.sum(sums) / jnp.sum(cnts))


def _reference(inputs, targets, true_labs, ignore_index=IGNORE_INDEX):
    """Pure-JAX reference mirroring the PyTorch module."""
    true_labs = list(true_labs)
    un_labels = [k for k in range(NUM_CLASSES) if k not in true_labs]
    den = jax.scipy.special.logsumexp(inputs, axis=1)                  # (N,H,W)
    outputs = jnp.zeros_like(inputs)
    bg = 0 if 0 in un_labels else 1
    lse_un = jax.scipy.special.logsumexp(inputs[:, un_labels], axis=1)
    outputs = outputs.at[:, bg].set(lse_un - den)
    outputs = outputs.at[:, true_labs].set(inputs[:, true_labs] - den[:, None])
    valid = targets != ignore_index
    safe_t = jnp.where(valid, targets, 0)
    picked = jnp.take_along_axis(outputs, safe_t[:, None], axis=1)[:, 0]
    return jnp.sum(jnp.where(valid, -picked, 0.0)) / jnp.sum(valid)


if __name__ == "__main__":
    key = jax.random.PRNGKey(0)

    def make_case(seed_i, n, h, w):
        k1, k2, k3 = jax.random.split(jax.random.fold_in(key, seed_i), 3)
        inputs = jax.random.normal(k1, (n, NUM_CLASSES, h, w), dtype=jnp.float32)
        targets = jax.random.randint(k2, (n, h, w), 0, NUM_CLASSES, dtype=jnp.int32)
        ign = jax.random.bernoulli(k3, 0.1, (n, h, w))
        targets = jnp.where(ign, IGNORE_INDEX, targets)
        return inputs, targets

    # Exercise the three bg/true-label configurations of the module.
    for cfg_i, true_labs in enumerate(([2, 3], [0, 3], [0, 1])):
        inputs, targets = make_case(cfg_i, 2, 16, 16)
        loss = jax.block_until_ready(
            unbiased_cross_entropy(inputs, targets, true_labs))
        ref = _reference(inputs, targets, true_labs)
        assert jnp.allclose(loss, ref, rtol=1e-5, atol=1e-5), (true_labs, loss, ref)

    # Ragged pixel-tile tail + forced 2-way core split (v7x megacore path):
    # 48x48 -> 18 pixel rows, tile_r=8 -> 3 tiles split across 2 "cores";
    # targets padded with ignore_index, last logits block partially OOB (masked).
    inputs, targets = make_case(7, 1, 48, 48)
    loss = jax.block_until_ready(
        unbiased_cross_entropy(inputs, targets, (2, 3), tile_rows=8, core_split=2))
    ref = _reference(inputs, targets, (2, 3))
    assert jnp.allclose(loss, ref, rtol=1e-5, atol=1e-5), (loss, ref)

    print("KERNEL_OK")
</pallas_src>

<mosaic_0001>
module attributes {stable_mosaic.version = 11 : i64} {
  func.func @_uce_kernel(%arg0: i32, %arg1: i32, %arg2: i32, %arg3: memref<1x4x2x128xf32, #tpu.memory_space<vmem>>, %arg4: memref<1x2x128xi8, #tpu.memory_space<vmem>>, %arg5: memref<1x1x1x128xf32, #tpu.memory_space<vmem>>, %arg6: memref<1x1x1x128xf32, #tpu.memory_space<vmem>>, %arg7: memref<2x128xf32, #tpu.memory_space<vmem>>, %arg8: memref<2x128xf32, #tpu.memory_space<vmem>>) attributes {dimension_semantics = [#tpu.dimension_semantics<parallel>, #tpu.dimension_semantics<parallel>, #tpu.dimension_semantics<arbitrary>], iteration_bounds = array<i64: 2, 1, 1>, scalar_prefetch = 0 : i64, scratch_operands = 2 : i64, tpu.core_type = #tpu.core_type<tc>, window_params = [{transform_indices = @transform_0, window_bounds = array<i64: 1, 4, 2, 128>}, {transform_indices = @transform_1, window_bounds = array<i64: 1, 2, 128>}, {transform_indices = @transform_2, window_bounds = array<i64: 1, 1, 1, 128>}, {transform_indices = @transform_3, window_bounds = array<i64: 1, 1, 1, 128>}]} {
    %c0_i32 = arith.constant 0 : i32
    %0 = arith.cmpi eq, %arg2, %c0_i32 : i32
    %1 = arith.extui %0 : i1 to i32
    %c0_i32_0 = arith.constant 0 : i32
    %2 = arith.cmpi ne, %1, %c0_i32_0 : i32
    scf.if %2 {
      %cst_28 = arith.constant 0.000000e+00 : f32
      %58 = vector.broadcast %cst_28 : f32 to vector<2x128xf32>
      %c0_29 = arith.constant 0 : index
      %c0_30 = arith.constant 0 : index
      %59 = vector.load %arg7[%c0_29, %c0_30] : memref<2x128xf32, #tpu.memory_space<vmem>>, vector<2x128xf32>
      tpu.vector_store %arg7[%c0_29, %c0_30], %58 {strides = array<i32>} : memref<2x128xf32, #tpu.memory_space<vmem>>, vector<2x128xf32>,
      %cst_31 = arith.constant 0.000000e+00 : f32
      %60 = vector.broadcast %cst_31 : f32 to vector<2x128xf32>
      %c0_32 = arith.constant 0 : index
      %c0_33 = arith.constant 0 : index
      %61 = vector.load %arg8[%c0_32, %c0_33] : memref<2x128xf32, #tpu.memory_space<vmem>>, vector<2x128xf32>
      tpu.vector_store %arg8[%c0_32, %c0_33], %60 {strides = array<i32>} : memref<2x128xf32, #tpu.memory_space<vmem>>, vector<2x128xf32>,
    } else {
    }
    %c0 = arith.constant 0 : index
    %c0_1 = arith.constant 0 : index
    %c0_2 = arith.constant 0 : index
    %3 = vector.load %arg4[%c0, %c0_1, %c0_2] : memref<1x2x128xi8, #tpu.memory_space<vmem>>, vector<1x2x128xi8>
    %4 = vector.shape_cast %3 : vector<1x2x128xi8> to vector<2x128xi8>
    %5 = arith.extsi %4 : vector<2x128xi8> to vector<2x128xi32>
    %c0_3 = arith.constant 0 : index
    %c0_4 = arith.constant 0 : index
    %c0_5 = arith.constant 0 : index
    %c0_6 = arith.constant 0 : index
    %6 = vector.load %arg3[%c0_3, %c0_4, %c0_5, %c0_6] : memref<1x4x2x128xf32, #tpu.memory_space<vmem>>, vector<1x1x2x128xf32>
    %7 = vector.shape_cast %6 : vector<1x1x2x128xf32> to vector<2x128xf32>
    %c0_7 = arith.constant 0 : index
    %c1 = arith.constant 1 : index
    %c0_8 = arith.constant 0 : index
    %c0_9 = arith.constant 0 : index
    %8 = vector.load %arg3[%c0_7, %c1, %c0_8, %c0_9] : memref<1x4x2x128xf32, #tpu.memory_space<vmem>>, vector<1x1x2x128xf32>
    %9 = vector.shape_cast %8 : vector<1x1x2x128xf32> to vector<2x128xf32>
    %c0_10 = arith.constant 0 : index
    %c2 = arith.constant 2 : index
    %c0_11 = arith.constant 0 : index
    %c0_12 = arith.constant 0 : index
    %10 = vector.load %arg3[%c0_10, %c2, %c0_11, %c0_12] : memref<1x4x2x128xf32, #tpu.memory_space<vmem>>, vector<1x1x2x128xf32>
    %11 = vector.shape_cast %10 : vector<1x1x2x128xf32> to vector<2x128xf32>
    %c0_13 = arith.constant 0 : index
    %c3 = arith.constant 3 : index
    %c0_14 = arith.constant 0 : index
    %c0_15 = arith.constant 0 : index
    %12 = vector.load %arg3[%c0_13, %c3, %c0_14, %c0_15] : memref<1x4x2x128xf32, #tpu.memory_space<vmem>>, vector<1x1x2x128xf32>
    %13 = vector.shape_cast %12 : vector<1x1x2x128xf32> to vector<2x128xf32>
    %14 = arith.maximumf %7, %9 : vector<2x128xf32>
    %15 = arith.maximumf %11, %13 : vector<2x128xf32>
    %16 = arith.maximumf %14, %15 : vector<2x128xf32>
    %17 = arith.subf %7, %16 : vector<2x128xf32>
    %18 = math.exp %17 : vector<2x128xf32>
    %19 = arith.subf %9, %16 : vector<2x128xf32>
    %20 = math.exp %19 : vector<2x128xf32>
    %21 = arith.subf %11, %16 : vector<2x128xf32>
    %22 = math.exp %21 : vector<2x128xf32>
    %23 = arith.subf %13, %16 : vector<2x128xf32>
    %24 = math.exp %23 : vector<2x128xf32>
    %25 = arith.addf %18, %20 : vector<2x128xf32>
    %26 = arith.addf %22, %24 : vector<2x128xf32>
    %27 = arith.addf %25, %26 : vector<2x128xf32>
    %28 = arith.addf %18, %20 : vector<2x128xf32>
    %c0_i32_16 = arith.constant 0 : i32
    %29 = vector.broadcast %c0_i32_16 : i32 to vector<2x128xi32>
    %30 = arith.cmpi eq, %5, %29 : vector<2x128xi32>
    %31 = arith.select %30, %28, %27 : vector<2x128xi1>, vector<2x128xf32>
    %c2_i32 = arith.constant 2 : i32
    %32 = vector.broadcast %c2_i32 : i32 to vector<2x128xi32>
    %33 = arith.cmpi eq, %5, %32 : vector<2x128xi32>
    %34 = arith.select %33, %22, %31 : vector<2x128xi1>, vector<2x128xf32>
    %c3_i32 = arith.constant 3 : i32
    %35 = vector.broadcast %c3_i32 : i32 to vector<2x128xi32>
    %36 = arith.cmpi eq, %5, %35 : vector<2x128xi32>
    %37 = arith.select %36, %24, %34 : vector<2x128xi1>, vector<2x128xf32>
    %38 = math.log %27 : vector<2x128xf32>
    %cst = arith.constant 9.99999991E-38 : f32
    %39 = vector.broadcast %cst : f32 to vector<2x128xf32>
    %40 = arith.maximumf %37, %39 : vector<2x128xf32>
    %41 = math.log %40 : vector<2x128xf32>
    %42 = arith.subf %41, %38 : vector<2x128xf32>
    %c-100_i32 = arith.constant -100 : i32
    %43 = vector.broadcast %c-100_i32 : i32 to vector<2x128xi32>
    %44 = arith.cmpi ne, %5, %43 : vector<2x128xi32>
    %cst_17 = arith.constant 0.000000e+00 : f32
    %45 = vector.broadcast %cst_17 : f32 to vector<2x128xf32>
    %46 = arith.select %44, %42, %45 : vector<2x128xi1>, vector<2x128xf32>
    %47 = arith.extui %44 : vector<2x128xi1> to vector<2x128xi32>
    %48 = arith.sitofp %47 : vector<2x128xi32> to vector<2x128xf32>
    %c0_18 = arith.constant 0 : index
    %c0_19 = arith.constant 0 : index
    %49 = vector.load %arg7[%c0_18, %c0_19] : memref<2x128xf32, #tpu.memory_space<vmem>>, vector<2x128xf32>
    %50 = arith.addf %49, %46 : vector<2x128xf32>
    %c0_20 = arith.constant 0 : index
    %c0_21 = arith.constant 0 : index
    %51 = vector.load %arg7[%c0_20, %c0_21] : memref<2x128xf32, #tpu.memory_space<vmem>>, vector<2x128xf32>
    tpu.vector_store %arg7[%c0_20, %c0_21], %50 {strides = array<i32>} : memref<2x128xf32, #tpu.memory_space<vmem>>, vector<2x128xf32>,
    %c0_22 = arith.constant 0 : index
    %c0_23 = arith.constant 0 : index
    %52 = vector.load %arg8[%c0_22, %c0_23] : memref<2x128xf32, #tpu.memory_space<vmem>>, vector<2x128xf32>
    %53 = arith.addf %52, %48 : vector<2x128xf32>
    %c0_24 = arith.constant 0 : index
    %c0_25 = arith.constant 0 : index
    %54 = vector.load %arg8[%c0_24, %c0_25] : memref<2x128xf32, #tpu.memory_space<vmem>>, vector<2x128xf32>
    tpu.vector_store %arg8[%c0_24, %c0_25], %53 {strides = array<i32>} : memref<2x128xf32, #tpu.memory_space<vmem>>, vector<2x128xf32>,
    %c0_i32_26 = arith.constant 0 : i32
    %55 = arith.cmpi eq, %arg2, %c0_i32_26 : i32
    %56 = arith.extui %55 : i1 to i32
    %c0_i32_27 = arith.constant 0 : i32
    %57 = arith.cmpi ne, %56, %c0_i32_27 : i32
    scf.if %57 {
      %c0_28 = arith.constant 0 : index
      %c0_29 = arith.constant 0 : index
      %58 = vector.load %arg7[%c0_28, %c0_29] : memref<2x128xf32, #tpu.memory_space<vmem>>, vector<2x128xf32>
      %cst_30 = arith.constant dense<0.000000e+00> : vector<128xf32>
      %59 = vector.multi_reduction <add>, %58, %cst_30 [0] : vector<2x128xf32> to vector<128xf32>
      %60 = vector.shape_cast %59 : vector<128xf32> to vector<1x128xf32>
      %c0_31 = arith.constant 0 : index
      %c0_32 = arith.constant 0 : index
      %c0_33 = arith.constant 0 : index
      %c0_34 = arith.constant 0 : index
      %61 = vector.load %arg5[%c0_31, %c0_32, %c0_33, %c0_34] : memref<1x1x1x128xf32, #tpu.memory_space<vmem>>, vector<1x1x1x128xf32>
      %62 = vector.shape_cast %61 : vector<1x1x1x128xf32> to vector<1x128xf32>
      %63 = vector.shape_cast %60 : vector<1x128xf32> to vector<1x1x1x128xf32>
      tpu.vector_store %arg5[%c0_31, %c0_32, %c0_33, %c0_34], %63 {strides = array<i32>} : memref<1x1x1x128xf32, #tpu.memory_space<vmem>>, vector<1x1x1x128xf32>,
      %c0_35 = arith.constant 0 : index
      %c0_36 = arith.constant 0 : index
      %64 = vector.load %arg8[%c0_35, %c0_36] : memref<2x128xf32, #tpu.memory_space<vmem>>, vector<2x128xf32>
      %cst_37 = arith.constant dense<0.000000e+00> : vector<128xf32>
      %65 = vector.multi_reduction <add>, %64, %cst_37 [0] : vector<2x128xf32> to vector<128xf32>
      %66 = vector.shape_cast %65 : vector<128xf32> to vector<1x128xf32>
      %c0_38 = arith.constant 0 : index
      %c0_39 = arith.constant 0 : index
      %c0_40 = arith.constant 0 : index
      %c0_41 = arith.constant 0 : index
      %67 = vector.load %arg6[%c0_38, %c0_39, %c0_40, %c0_41] : memref<1x1x1x128xf32, #tpu.memory_space<vmem>>, vector<1x1x1x128xf32>
      %68 = vector.shape_cast %67 : vector<1x1x1x128xf32> to vector<1x128xf32>
      %69 = vector.shape_cast %66 : vector<1x128xf32> to vector<1x1x1x128xf32>
      tpu.vector_store %arg6[%c0_38, %c0_39, %c0_40, %c0_41], %69 {strides = array<i32>} : memref<1x1x1x128xf32, #tpu.memory_space<vmem>>, vector<1x1x1x128xf32>,
    } else {
    }
    return
  }
  func.func @transform_0(%arg0: i32, %arg1: i32, %arg2: i32) -> (i32, i32, i32, i32) {
    %c1_i32 = arith.constant 1 : i32
    %0 = arith.muli %arg1, %c1_i32 : i32
    %1 = arith.addi %0, %arg2 : i32
    %c0_i32 = arith.constant 0 : i32
    %2 = arith.minsi %1, %c0_i32 : i32
    %c0_i32_0 = arith.constant 0 : i32
    %c0_i32_1 = arith.constant 0 : i32
    %c0_i32_2 = arith.constant 0 : i32
    return %arg0, %c0_i32_0, %2, %c0_i32_1 : i32, i32, i32, i32
  }
  func.func @transform_1(%arg0: i32, %arg1: i32, %arg2: i32) -> (i32, i32, i32) {
    %c1_i32 = arith.constant 1 : i32
    %0 = arith.muli %arg1, %c1_i32 : i32
    %1 = arith.addi %0, %arg2 : i32
    %c0_i32 = arith.constant 0 : i32
    %c0_i32_0 = arith.constant 0 : i32
    return %arg0, %1, %c0_i32 : i32, i32, i32
  }
  func.func @transform_2(%arg0: i32, %arg1: i32, %arg2: i32) -> (i32, i32, i32, i32) {
    %c0_i32 = arith.constant 0 : i32
    %c0_i32_0 = arith.constant 0 : i32
    %c0_i32_1 = arith.constant 0 : i32
    return %arg0, %arg1, %c0_i32, %c0_i32_0 : i32, i32, i32, i32
  }
  func.func @transform_3(%arg0: i32, %arg1: i32, %arg2: i32) -> (i32, i32, i32, i32) {
    %c0_i32 = arith.constant 0 : i32
    %c0_i32_0 = arith.constant 0 : i32
    %c0_i32_1 = arith.constant 0 : i32
    return %arg0, %arg1, %c0_i32, %c0_i32_0 : i32, i32, i32, i32
  }
}

</mosaic_0001>

<bundles_post_ra>
// kernel: tpu_custom_call.1
= control target key start
LH: loop header
LB: loop body
LE: loop exit
PB: predicated region body
PF: predicated region fallthrough
CT: control target
= control target key end

     0   :  { %9 = vsyncpa [#allocation5], 0  ;;  %s997_s0 = inlined_call_operand.hbm [shape: f32[2,4,2,128], index: 0, kind: input, shape index: {}]   ;;  %s998_s1 = inlined_call_operand.vmem [shape: s8[2,2,128], index: 1, kind: input, shape index: {}]   ;;  %s999_s2 = inlined_call_operand.hbm [shape: f32[2,1,1,128], index: 2, kind: output, shape index: {0}]   ;;  %s1000_s3 = inlined_call_operand.hbm [shape: f32[2,1,1,128], index: 3, kind: output, shape index: {1}]  }
   0x1   :  { %11 = vsyncpa [#allocation5 + $0x1], 0 }
   0x2   :  { %12 = vsyncpa [#allocation6], 0 }
   0x3   :  { %14 = vsyncpa [#allocation6 + $0x1], 0 }
   0x4   :  { %15 = vsyncpa [#allocation9], 0 }
   0x5   :  { %17 = vsyncpa [#allocation9 + $0x1], 0  ;;  %s770_s12 = smov 0   ;;  %s772_s13 = smov 0  }
   0x6   :  { %s774_s14 = smov 0   ;;  %s776_s15 = smov 0  }
   0x7   :  { %s778_s16 = smov 0   ;;  %s780_s17 = smov 0  }
   0x8 LB: > { %s498_s18 = sadd.s32 4294967295, %s742_s17   ;;  %s499_s19 = sadd.s32 4294967294, %s742_s17   ;;  %s742_s17 = sphi %s780_s17, %s23_s17   ;;  %s738_s16 = sphi %s778_s16, %s1015_s16   ;;  %s734_s15 = sphi %s776_s15, %s1014_s15   ;;  %s730_s14 = sphi %s774_s14, %s1013_s14   ;;  %s726_s13 = sphi %s772_s13, %s1012_s13   ;;  %s722_s12 = sphi %s770_s12, %s1011_s12  }
   0x9   : > { %s42_s20 = sadd.s32 1, %s738_s16  ;;  %s57_s21 = sadd.s32 1, %s730_s14 }
   0xa   : > { %p44_p0 = scmp.ge.s32.totalorder %s42_s20, 2  ;;  %p64_p1 = scmp.ne.s32.totalorder %s730_s14, %s726_s13 }
   0xb   : > { %p65_p2 = scmp.eq.s32.totalorder %s742_s17, 0  ;;  %p70_p3 = scmp.ne.s32.totalorder %s726_s13, %s722_s12 }
   0xc   : > { %s1017_s20 = smov (%p44_p0, %s42_s20), 0  ;;  %p71_p5 = scmp.eq.s32.totalorder %s498_s18, 0 }
   0xd   : > { %p811_p4 = por %p65_p2, %p64_p1  ;;  %s52_s23 = ssub.s32 %s738_s16, %s1017_s20 }
   0xe   : > { %p126_p6 = scmp.eq.s32.totalorder %s498_s18, 1  ;;  %p55_p7 = scmp.eq.s32.totalorder %s52_s23, 0 }
   0xf   : > { %p817_p8 = por %p71_p5, %p70_p3  ;;  %p132_p10 = scmp.eq.s32.totalorder %s499_s19, 1 }
  0x10   : > { %p821_p9 = por %p126_p6, %p64_p1  ;;  %p533_p13 = scmp.lt.s32.totalorder %s742_s17, 2 }
  0x11   : > { %s826_s26 = scalar_select %p55_p7, %s730_s14, %s57_s21  }
  0x12   : > { %s1004_s25 = scalar_select %p821_p9, 1, 0 }
  0x13   : > { %p828_p11 = por %p132_p10, %p70_p3  ;;  %s180_s28 = sand.u32 1, %s730_s14  }
  0x14   : > { %s502_s29 = sshll.u32 %s180_s28, 3  ;;  %s515_s30 = sshll.u32 %s738_s16, 7 }
  0x15   : > { %s1005_s27 = scalar_select %p828_p11, 1, 0 }
  0x16   : > { %s839_s6 = scalar_lea.hbm %s997_s0, %s515_s30  ;;  %s184_s7 = scalar_lea.vmem [#allocation4], %s502_s29 }
  0x17   : > { %s195_s8 = sshll.u32 %s184_s7, 4  ;;  %p845_p0 = pnand %p533_p13, %p811_p4  ;;  %s841_s8 = int_to_ptr.vmem [resolvable:$true] %s195_s8 }
  0x18   : > { %s850_s10 = scalar_lea.sflag [#allocation5], %s180_s28  ;;  %s598_s11 = scalar_lea.hbm %s839_s6, 128 }
  0x19   : > { %p599_p2 = scmp.ne.s32.totalorder %s839_s6, %s598_s11  ;;  %p600_p3 = pneg %p845_p0 }
  0x1a   : > { %s603_s21 = scalar_lea.hbm %s997_s0, 256  ;;  %p604_p4 = scmp.lt.u32.totalorder %s839_s6, %s997_s0 }
  0x1b   : > { %p601_p5 = pnand %p600_p3, %p599_p2  ;;  %p605_p7 = scmp.lt.u32.totalorder %s603_s21, %s598_s11 }
  0x1c   : > { %p607_p13 = scmp.lt.u32.totalorder %s598_s11, %s839_s6 }
  0x1d   : > { %p602_p6 = pneg %p601_p5  ;;  %p606_p10 = por %p605_p7, %p604_p4 }
  0x1f   : > { %p608_p12 = por %p607_p13, %p606_p10 }
  0x21   : > { %p609_p1 = pnand %p608_p12, %p602_p6 }
  0x23   : > { %612 = shalt.err (!%p609_p1)
}
  0x24   : > { %s613_s28 = scalar_lea.vmem %s841_s8, 128  ;;  %s744_s29 = smov [#allocation4]  }
  0x25   : > { %p614_p2 = scmp.ne.s32.totalorder %s841_s8, %s613_s28  ;;  %s618_s30 = sshll.u32 %s744_s29, 4  ;;  %s619_s30 = int_to_ptr.vmem [resolvable:$false] %s618_s30 }
  0x26   : > { %s620_s4 = scalar_lea.vmem %s619_s30, 256  ;;  %p621_p9 = scmp.lt.s32.totalorder %s841_s8, %s619_s30 }
  0x27   : > { %p616_p5 = pnand %p614_p2, %p600_p3  ;;  %p622_p4 = scmp.lt.s32.totalorder %s620_s4, %s613_s28 }
  0x29   : > { %p617_p11 = pneg %p616_p5  ;;  %p623_p7 = por %p622_p4, %p621_p9 }
  0x2b   : > { %p624_p10 = pnand %p623_p7, %p617_p11 }
  0x2d   : > { %627 = shalt.err (!%p624_p10)
}
  0x2e   : > { %s745_s5 = smov 32   ;;  %s746_s7 = smov 2  }
  0x2f   : > { %525 = dma.hbm_to_vmem [thread:$0]  (!%p845_p0), %s839_s6, 128, %s841_s8, %s850_s10, %s745_s5, %s745_s5, %s746_s7  }
  0x30   : > { %p214_p12 = scmp.lt.s32.totalorder %s742_s17, 3  ;;  %p1007_p1 = scmp.ge.s32.totalorder %s742_s17, 1 }
  0x32   : > { %p215_p3 = pnand %p1007_p1, %p214_p12 }
  0x33   : > { %s882_s11 = sand.u32 (!%p215_p3), 1, %s726_s13  }
  0x34   : > { %218 = sbr.rel (%p215_p3) target bundleno = 162 (0xa2), region = 28  ;;  %s506_s18 = sshll.u32 (!%p215_p3), %s882_s11, 3 }
  0x35   : > { %s221_s19 = scalar_lea.sflag (!%p215_p3), [#allocation5], %s882_s11  ;;  %s224_s21 = scalar_lea.vmem (!%p215_p3), [#allocation4], %s506_s18 }
  0x3b   : > { %709 = dma.done.wait (%p817_p8), %s221_s19, 128  }
  0x3c   : > { %711 = vsyncadd (%p817_p8), %s221_s19, 4294967168  ;;  %p261_p9 = scmp.lt.s32.totalorder %s734_s15, 1  ;;  %v747_v0 = vmov 0.0   ;;  %v276_v2 = vld [vmem:[%s224_s21] sm:$0x3]  ;;  %vm327_vm1 = vcmask 1041408  }
  0x3d   : > { %273 = vst [vmem:[#allocation3] sm:$0x3] %v747_v0  ;;  %272 = vst [vmem:[#allocation2] sm:$0x3] %v747_v0  ;;  %v507_v3 = vld [vmem:[%s224_s21 + $0x2] sm:$0x3] }
  0x3e   : > { %s262_s6 = scalar_select %p261_p9, %s734_s15, 1  ;;  %v508_v5 = vld [vmem:[%s224_s21 + $0x4] sm:$0x3]  ;;  %v509_v6 = vld [vmem:[%s224_s21 + $0x6] sm:$0x3]  ;;  %v283_v7 = vmax.f32 %v276_v2, %v507_v3 }
  0x3f   : > { %v284_v9 = vmax.f32 %v508_v5, %v509_v6  ;;  %s256_s24 = scalar_lea.vmem [#allocation8], %s882_s11  ;;  %s511_s23 = sshll.u32 %s734_s15, 4 }
  0x40   : > { %s266_s10 = scalar_lea.vmem %s998_s1, %s262_s6  ;;  %s377_s22 = sshll.u32 %s256_s24, 4  ;;  %s904_s22 = int_to_ptr.vmem [resolvable:$true] %s377_s22 }
  0x41   : > { %v274_v1 = vld [vmem:[%s266_s10] sm:$0x1]  ;;  %v285_v11 = vmax.f32 %v283_v7, %v284_v9  ;;  %s912_s30 = scalar_lea.hbm %s1000_s3, %s511_s23  ;;  %s350_s4 = scalar_lea.sflag [#allocation9], %s882_s11 }
  0x42   : > { %v895_v4 = vunpack.c.0.s8 %v274_v1  ;;  %s628_s5 = scalar_lea.vmem %s904_s22, 16  ;;  %p1008_p11 = scmp.ne.s32.totalorder %s1004_s25, 0 }
  0x43   : > { %v286_v13 = vsub.f32 %v276_v2, %v285_v11  ;;  %v289_v14 = vsub.f32 %v507_v3, %v285_v11  ;;  %v292_v15 = vsub.f32 %v508_v5, %v285_v11  ;;  %v295_v16 = vsub.f32 %v509_v6, %v285_v11  ;;  %p629_p8 = scmp.ne.s32.totalorder %s904_s22, %s628_s5  ;;  %s748_s7 = smov [#allocation8]  }
  0x44   : > { %v320_v8 = vld [vmem:[#allocation3] sm:$0x3]  ;;  %vm313_vm0 = vcmp.ne.s32.totalorder %v895_v4, 4294967196  ;;  %vm301_vm2 = vcmp.eq.s32.totalorder %v895_v4, 0  ;;  %vm303_vm3 = vcmp.eq.s32.totalorder %v895_v4, 2  ;;  %vm305_vm4 = vcmp.eq.s32.totalorder %v895_v4, 3 }
  0x45   : > { %v510_v10 = vsel %vm313_vm0, 1.0, %v747_v0  ;;  %v287_v17 = vmul.f32 1.442695, %v286_v13  ;;  %v290_v18 = vmul.f32 1.442695, %v289_v14  ;;  %p630_p0 = pnand %p629_p8, %p1008_p11  ;;  %s632_s18 = sshll.u32 %s748_s7, 4  ;;  %s633_s18 = int_to_ptr.vmem [resolvable:$false] %s632_s18 }
  0x46   : > { %v321_v12 = vadd.f32 %v510_v10, %v320_v8  ;;  %v293_v19 = vmul.f32 1.442695, %v292_v15  ;;  %v296_v20 = vmul.f32 1.442695, %v295_v16  ;;  %s634_s19 = scalar_lea.vmem %s633_s18, 32  ;;  %p635_p13 = scmp.lt.s32.totalorder %s904_s22, %s633_s18 }
  0x47   : > { %586 = vpow2.f32 %v287_v17  ;;  %p631_p6 = pneg %p630_p0  ;;  %p636_p2 = scmp.lt.s32.totalorder %s634_s19, %s628_s5 }
  0x48   : > { %322 = vst [vmem:[#allocation3] sm:$0x3] %v321_v12  ;;  %588 = vpow2.f32 %v290_v18 }
  0x49   : > { %590 = vpow2.f32 %v293_v19  ;;  %p637_p5 = por %p636_p2, %p635_p13 }
  0x4a   : > { %592 = vpow2.f32 %v296_v20 }
  0x4b   : > { %p638_p4 = pnand %p637_p5, %p631_p6 }
  0x4f   : > { %v336_v21 = vld [vmem:[#allocation3] sm:$0x3] }
  0x50   : > { %v337_v22 = vsel %vm327_vm1, %v336_v21, 0.0 }
  0x51   : > { %v338_v23 = vrot.slane %v337_v22, 4  ;;  %v587_v25 = vpop.eup %586 }
  0x52   : > { %v589_v27 = vpop.eup %588 }
  0x53   : > { %v339_v24 = vadd.f32 %v338_v23, %v337_v22  ;;  %v591_v28 = vpop.eup %590  ;;  %v298_v29 = vadd.f32 %v589_v27, %v587_v25 }
  0x54   : > { %v593_v31 = vpop.eup %592 }
  0x55   : > { %v340_v26 = vrot.slane %v339_v24, 2  ;;  %v299_v32 = vadd.f32 %v593_v31, %v591_v28 }
  0x57   : > { %v341_v30 = vadd.f32 %v340_v26, %v339_v24  ;;  %v300_v34 = vadd.f32 %v299_v32, %v298_v29 }
  0x59   : > { %v342_v33 = vrot.slane %v341_v30, 1  ;;  %v302_v36 = vsel %vm301_vm2, %v298_v29, %v300_v34  ;;  %594 = vlog2.f32 %v300_v34 }
  0x5a   : > { %v304_v37 = vsel %vm303_vm3, %v591_v28, %v302_v36 }
  0x5b   : > { %v343_v35 = vadd.f32 %v342_v33, %v341_v30 }
  0x5d   : > { %344 = vst [vmem:[%s256_s24] sm:$0x1] %v343_v35 }
  0x5e   : > { %641 = shalt.err (!%p638_p4)
}
  0x5f   : > { %s642_s21 = scalar_lea.hbm %s912_s30, 16  ;;  %s646_s9 = scalar_lea.hbm %s1000_s3, 32 }
  0x60   : > { %p643_p7 = scmp.ne.s32.totalorder %s912_s30, %s642_s21  ;;  %p647_p1 = scmp.lt.u32.totalorder %s912_s30, %s1000_s3 }
  0x61   : > { %p648_p3 = scmp.lt.u32.totalorder %s646_s9, %s642_s21  ;;  %p650_p8 = scmp.lt.u32.totalorder %s642_s21, %s912_s30 }
  0x62   : > { %p644_p10 = pnand %p643_p7, %p1008_p11 }
  0x63   : > { %p649_p9 = por %p648_p3, %p647_p1 }
  0x64   : > { %p645_p12 = pneg %p644_p10 }
  0x65   : > { %p651_p0 = por %p650_p8, %p649_p9 }
  0x67   : > { %p652_p6 = pnand %p651_p0, %p645_p12 }
  0x69   : > { %655 = shalt.err (!%p652_p6)
}
  0x6a   : > { %519 = dma.vmem_to_hbm [thread:$0]  (%p1008_p11), %s904_s22, 16, %s912_s30, %s350_s4   ;;  %v306_v38 = vsel %vm305_vm4, %v593_v31, %v304_v37  ;;  %v595_v40 = vpop.eup %594  ;;  %v317_v45 = vld [vmem:[#allocation2] sm:$0x3] }
  0x6b   : > { %v309_v39 = vmax.f32 %v306_v38, 1e-37  ;;  %v308_v41 = vmul.f32 0.6931472, %v595_v40  ;;  %s250_s22 = scalar_lea.vmem [#allocation7], %s882_s11  ;;  %s950_s4 = scalar_lea.hbm %s999_s2, %s511_s23 }
  0x6c   : > { %s363_s28 = sshll.u32 %s250_s22, 4  ;;  %s346_s5 = scalar_lea.sflag [#allocation6], %s882_s11  ;;  %s943_s28 = int_to_ptr.vmem [resolvable:$true] %s363_s28 }
  0x6d   : > { %596 = vlog2.f32 %v309_v39  ;;  %s656_s7 = scalar_lea.vmem %s943_s28, 16  ;;  %s749_s18 = smov [#allocation7]  }
  0x6e   : > { %p657_p13 = scmp.ne.s32.totalorder %s943_s28, %s656_s7  ;;  %s660_s19 = sshll.u32 %s749_s18, 4  ;;  %s661_s19 = int_to_ptr.vmem [resolvable:$false] %s660_s19 }
  0x6f   : > { %s662_s21 = scalar_lea.vmem %s661_s19, 32  ;;  %p663_p4 = scmp.lt.s32.totalorder %s943_s28, %s661_s19 }
  0x70   : > { %p658_p2 = pnand %p657_p13, %p1008_p11  ;;  %p664_p7 = scmp.lt.s32.totalorder %s662_s21, %s656_s7 }
  0x72   : > { %p659_p5 = pneg %p658_p2  ;;  %p665_p10 = por %p664_p7, %p663_p4 }
  0x74   : > { %p666_p12 = pnand %p665_p10, %p659_p5 }
  0x77   : > { %v597_v42 = vpop.eup %596 }
  0x78   : > { %v311_v43 = vmul.f32 0.6931472, %v597_v42 }
  0x7a   : > { %v312_v44 = vsub.f32 %v311_v43, %v308_v41 }
  0x7c   : > { %v314_v46 = vsel %vm313_vm0, %v312_v44, 0.0 }
  0x7d   : > { %v318_v47 = vadd.f32 %v317_v45, %v314_v46 }
  0x7f   : > { %319 = vst [vmem:[#allocation2] sm:$0x3] %v318_v47 }
  0x86   : > { %v326_v48 = vld [vmem:[#allocation2] sm:$0x3] }
  0x87   : > { %v328_v49 = vsel %vm327_vm1, %v326_v48, 0.0 }
  0x88   : > { %v329_v50 = vrot.slane %v328_v49, 4 }
  0x8a   : > { %v330_v51 = vadd.f32 %v329_v50, %v328_v49 }
  0x8c   : > { %v331_v52 = vrot.slane %v330_v51, 2 }
  0x8e   : > { %v332_v53 = vadd.f32 %v331_v52, %v330_v51 }
  0x90   : > { %v333_v54 = vrot.slane %v332_v53, 1 }
  0x92   : > { %v334_v55 = vadd.f32 %v333_v54, %v332_v53 }
  0x94   : > { %335 = vst [vmem:[%s250_s22] sm:$0x1] %v334_v55 }
  0x95   : > { %669 = shalt.err (!%p666_p12)
}
  0x96   : > { %s670_s15 = scalar_lea.hbm %s950_s4, 16  ;;  %s674_s6 = scalar_lea.hbm %s999_s2, 32 }
  0x97   : > { %p671_p1 = scmp.ne.s32.totalorder %s950_s4, %s670_s15  ;;  %p675_p8 = scmp.lt.u32.totalorder %s950_s4, %s999_s2 }
  0x98   : > { %p676_p0 = scmp.lt.u32.totalorder %s674_s6, %s670_s15  ;;  %p678_p13 = scmp.lt.u32.totalorder %s670_s15, %s950_s4 }
  0x99   : > { %p672_p3 = pnand %p671_p1, %p1008_p11 }
  0x9a   : > { %p677_p6 = por %p676_p0, %p675_p8 }
  0x9b   : > { %p673_p9 = pneg %p672_p3 }
  0x9c   : > { %p679_p2 = por %p678_p13, %p677_p6 }
  0x9e   : > { %p680_p5 = pnand %p679_p2, %p673_p9 }
  0xa0   : > { %683 = shalt.err (!%p680_p5)
}
  0xa1   : > { %518 = dma.vmem_to_hbm [thread:$0]  (%p1008_p11), %s943_s28, 16, %s950_s4, %s346_s5  }
  0xa2 PF: > { %s389_s10 = sand.u32 1, %s722_s12   ;;  %p1009_p4 = scmp.ne.s32.totalorder %s1005_s27, 0 }
  0xa3   : > { %p1010_p7 = scmp.ge.s32.totalorder %s742_s17, 2  ;;  %s390_s24 = scalar_lea.sflag [#allocation6], %s389_s10 }
  0xa5   : > { %p527_p10 = pnand %p1010_p7, %p1009_p4 }
  0xa7   : > { %713 = dma.done.wait (!%p527_p10), %s390_s24, 16  }
  0xa8   : > { %715 = vsyncadd (!%p527_p10), %s390_s24, 4294967280  ;;  %s398_s22 = scalar_lea.sflag [#allocation9], %s389_s10 }
  0xa9   : > { %717 = dma.done.wait (!%p527_p10), %s398_s22, 16  }
  0xaa   : > { %719 = vsyncadd (!%p527_p10), %s398_s22, 4294967280  ;;  %s23_s17 = sadd.s32 1, %s742_s17   ;;  %s1011_s12 = smov %s726_s13 }
  0xab   : > { %p20_p12 = scmp.ge.s32.totalorder %s23_s17, 4   ;;  %s1012_s13 = smov %s730_s14 }
  0xac   : > { %s1013_s14 = smov %s826_s26  ;;  %s1014_s15 = smov %s738_s16 }
  0xad   : > { %s1015_s16 = smov %s1017_s20  ;;  %22 = sbr.rel (!%p20_p12) target bundleno = 8 (0x8), region = 104 }
  0xb4   :  { %402 = vsyncpa [#allocation5], 1 }
  0xb5   :  { %404 = vsyncpa [#allocation5 + $0x1], 1 }
  0xb6   :  { %405 = vsyncpa [#allocation6], 1 }
  0xb7   :  { %407 = vsyncpa [#allocation6 + $0x1], 1 }
  0xb8   :  { %408 = vsyncpa [#allocation9], 1 }
  0xb9   :  { %410 = vsyncpa [#allocation9 + $0x1], 1 }

</bundles_post_ra>
